<compile_context>
chip_gen: v6e
topology: v6e:2x2x1
jax: 0.10.0
libtpu: 0.0.40
codegen_flags: <defaults>
</compile_context>

<pallas_src>
import functools

import jax
import jax.numpy as jnp
from jax.experimental import pallas as pl
from jax.experimental.pallas import tpu as pltpu


def _round_up(x: int, m: int) -> int:
    return ((x + m - 1) // m) * m


# ----------------------------------------------------------------------------
# Kernels
# ----------------------------------------------------------------------------
def _pos_enc_matmul_kernel(x_ref, w_ref, b_ref, o_ref):
    """Grouped lane-dense path: x (TR, 3G) @ w (3G, 128) + b (1, 128)."""
    acc = jnp.dot(x_ref[...], w_ref[...], preferred_element_type=jnp.float32)
    o_ref[...] = (acc + b_ref[...]).astype(o_ref.dtype)


def _pos_enc_fma_kernel(x_ref, w_ref, b_ref, o_ref):
    """Plain path (D4 >= 128): K=3 contraction as three VPU broadcast-FMAs."""
    x = x_ref[...]          # (TM, 3)
    w = w_ref[...]          # (3, D4)
    acc = x[:, 0:1] * w[0:1, :] + b_ref[...]
    acc = acc + x[:, 1:2] * w[1:2, :]
    acc = acc + x[:, 2:3] * w[2:3, :]
    o_ref[...] = acc.astype(o_ref.dtype)


# ----------------------------------------------------------------------------
# Wrapper
# ----------------------------------------------------------------------------
@functools.partial(jax.jit, static_argnames=("tile_points",))
def simplified_positional_encoding(points, weight, bias, *, tile_points=8192):
    """points: [B, N, 3]; weight: [3, D4]; bias: [D4] -> [B, N, D4].

    `weight` is stored as [in=3, out=D4] (transpose of torch Linear.weight).
    """
    B, N, C = points.shape
    assert C == 3
    D4 = weight.shape[1]
    M = B * N
    dtype = points.dtype

    x = points.reshape(M, 3)
    compiler_params = pltpu.CompilerParams(dimension_semantics=("parallel",))

    if D4 < 128 and 128 % D4 == 0:
        # ------------------ lane-dense grouped path ------------------
        G = 128 // D4                           # points packed per output row
        rows_total = pl.cdiv(M, G)
        # ~512 KiB output block per step (tr rows of 128 f32), capped at 4096.
        tr = min(max(8, tile_points // G), 4096, _round_up(rows_total, 8))
        tr = _round_up(tr, 8)
        rows_padded = _round_up(rows_total, tr)
        Mp = rows_padded * G
        if Mp != M:
            x = jnp.pad(x, ((0, Mp - M), (0, 0)))
        x_eff = x.reshape(rows_padded, 3 * G)   # free row-major view of [Mp,3]

        # Block-diagonal weight: W_big[3g+k, g*D4+d] = w[k, d]   -> (3G, 128)
        w_eff = jnp.kron(jnp.eye(G, dtype=weight.dtype), weight)
        b_eff = jnp.tile(bias, G).reshape(1, 128)

        out = pl.pallas_call(
            _pos_enc_matmul_kernel,
            out_shape=jax.ShapeDtypeStruct((rows_padded, 128), dtype),
            grid_spec=pltpu.PrefetchScalarGridSpec(
                num_scalar_prefetch=0,
                grid=(rows_padded // tr,),
                in_specs=[
                    pl.BlockSpec((tr, 3 * G), lambda i: (i, 0)),   # x tile
                    pl.BlockSpec((3 * G, 128), lambda i: (0, 0)),  # weight (resident)
                    pl.BlockSpec((1, 128), lambda i: (0, 0)),      # bias (resident)
                ],
                out_specs=pl.BlockSpec((tr, 128), lambda i: (i, 0)),
            ),
            compiler_params=compiler_params,
        )(x_eff, w_eff, b_eff)

        out = out.reshape(Mp, D4)[:M]           # free view + drop padding
    else:
        # ------------------ plain path (D4 >= 128 or odd D4) ------------------
        # Output last dim is already a (multiple of) 128 in the usual case, so
        # stores are dense; do the K=3 contraction on the VPU.
        tm_cap = max(8, (2 * 1024 * 1024) // (4 * D4))   # ~2 MiB output block
        tm = min(tile_points, tm_cap, _round_up(M, 8))
        tm = _round_up(tm, 8)
        Mp = _round_up(M, tm)
        if Mp != M:
            x = jnp.pad(x, ((0, Mp - M), (0, 0)))
        b_eff = bias.reshape(1, D4)

        out = pl.pallas_call(
            _pos_enc_fma_kernel,
            out_shape=jax.ShapeDtypeStruct((Mp, D4), dtype),
            grid_spec=pltpu.PrefetchScalarGridSpec(
                num_scalar_prefetch=0,
                grid=(Mp // tm,),
                in_specs=[
                    pl.BlockSpec((tm, 3), lambda i: (i, 0)),    # x tile
                    pl.BlockSpec((3, D4), lambda i: (0, 0)),    # weight (resident)
                    pl.BlockSpec((1, D4), lambda i: (0, 0)),    # bias (resident)
                ],
                out_specs=pl.BlockSpec((tm, D4), lambda i: (i, 0)),
            ),
            compiler_params=compiler_params,
        )(x, weight, b_eff)

        out = out[:M]

    return out.reshape(B, N, D4)


# ----------------------------------------------------------------------------
# Demo / self-test
# ----------------------------------------------------------------------------
if __name__ == "__main__":
    # Shapes consistent with the module: batch=2, N=16 points, d_model=32.
    B, N, d_model = 2, 16, 32
    D4 = d_model // 4

    key = jax.random.PRNGKey(0)
    k_pts, k_w, k_b, k_pts2 = jax.random.split(key, 4)

    points = jax.random.normal(k_pts, (B, N, 3), dtype=jnp.float32)

    # Deterministic nn.Linear(3, d_model//4)-style init: U(-1/sqrt(3), 1/sqrt(3)).
    bound = 1.0 / jnp.sqrt(3.0)
    # Stored as [in=3, out=D4] (transpose of torch's [out, in] weight).
    weight = jax.random.uniform(k_w, (3, D4), minval=-bound, maxval=bound,
                                dtype=jnp.float32)
    bias = jax.random.uniform(k_b, (D4,), minval=-bound, maxval=bound,
                              dtype=jnp.float32)

    out = simplified_positional_encoding(points, weight, bias)
    out = jax.block_until_ready(out)
    ref = points @ weight + bias
    assert out.shape == (B, N, D4)
    assert jnp.allclose(out, ref, atol=1e-5, rtol=1e-5)

    # Second check: larger ragged M with a small tile so the grid has >1 step
    # and the padding path is exercised.
    B2, N2 = 2, 4000          # M = 8000, not a tile multiple
    points2 = jax.random.normal(k_pts2, (B2, N2, 3), dtype=jnp.float32)
    out2 = simplified_positional_encoding(points2, weight, bias,
                                          tile_points=2048)
    out2 = jax.block_until_ready(out2)
    ref2 = points2 @ weight + bias
    assert out2.shape == (B2, N2, D4)
    assert jnp.allclose(out2, ref2, atol=1e-5, rtol=1e-5)

    print("KERNEL_OK")
</pallas_src>

<mosaic_0001>
module attributes {stable_mosaic.version = 11 : i64} {
  func.func @_pos_enc_matmul_kernel(%arg0: i32, %arg1: memref<8x48xf32, #tpu.memory_space<vmem>>, %arg2: memref<48x128xf32, #tpu.memory_space<vmem>>, %arg3: memref<1x128xf32, #tpu.memory_space<vmem>>, %arg4: memref<8x128xf32, #tpu.memory_space<vmem>>) attributes {dimension_semantics = [#tpu.dimension_semantics<parallel>], iteration_bounds = array<i64: 1>, scalar_prefetch = 0 : i64, scratch_operands = 0 : i64, tpu.core_type = #tpu.core_type<tc>, window_params = [{transform_indices = @transform_0, window_bounds = array<i64: 8, 48>}, {pipeline_mode = #tpu.pipeline_mode<synchronous>, transform_indices = @transform_1, window_bounds = array<i64: 48, 128>}, {pipeline_mode = #tpu.pipeline_mode<synchronous>, transform_indices = @transform_2, window_bounds = array<i64: 1, 128>}, {transform_indices = @transform_3, window_bounds = array<i64: 8, 128>}]} {
    %c0 = arith.constant 0 : index
    %c0_0 = arith.constant 0 : index
    %0 = vector.load %arg1[%c0, %c0_0] : memref<8x48xf32, #tpu.memory_space<vmem>>, vector<8x48xf32>
    %c0_1 = arith.constant 0 : index
    %c0_2 = arith.constant 0 : index
    %1 = vector.load %arg2[%c0_1, %c0_2] : memref<48x128xf32, #tpu.memory_space<vmem>>, vector<48x128xf32>
    %cst = arith.constant dense<0.000000e+00> : vector<8x128xf32>
    %2 = tpu.matmul %0, %1, %cst {dimension_numbers = #tpu.dot_dimension_numbers<[1], [0], [0], [1], [0, 0, 1, 1], [], []>} : vector<8x48xf32>, vector<48x128xf32>, vector<8x128xf32> -> vector<8x128xf32>
    %c0_3 = arith.constant 0 : index
    %c0_4 = arith.constant 0 : index
    %3 = vector.load %arg3[%c0_3, %c0_4] : memref<1x128xf32, #tpu.memory_space<vmem>>, vector<1x128xf32>
    %4 = vector.broadcast %3 : vector<1x128xf32> to vector<8x128xf32>
    %5 = arith.addf %2, %4 : vector<8x128xf32>
    %c0_5 = arith.constant 0 : index
    %c0_6 = arith.constant 0 : index
    %6 = vector.load %arg4[%c0_5, %c0_6] : memref<8x128xf32, #tpu.memory_space<vmem>>, vector<8x128xf32>
    tpu.vector_store %arg4[%c0_5, %c0_6], %5 {strides = array<i32>} : memref<8x128xf32, #tpu.memory_space<vmem>>, vector<8x128xf32>,
    return
  }
  func.func @transform_0(%arg0: i32) -> (i32, i32) {
    %c0_i32 = arith.constant 0 : i32
    %c0_i32_0 = arith.constant 0 : i32
    return %arg0, %c0_i32 : i32, i32
  }
  func.func @transform_1(%arg0: i32) -> (i32, i32) {
    %c0_i32 = arith.constant 0 : i32
    %c0_i32_0 = arith.constant 0 : i32
    %c0_i32_1 = arith.constant 0 : i32
    return %c0_i32, %c0_i32_0 : i32, i32
  }
  func.func @transform_2(%arg0: i32) -> (i32, i32) {
    %c0_i32 = arith.constant 0 : i32
    %c0_i32_0 = arith.constant 0 : i32
    %c0_i32_1 = arith.constant 0 : i32
    return %c0_i32, %c0_i32_0 : i32, i32
  }
  func.func @transform_3(%arg0: i32) -> (i32, i32) {
    %c0_i32 = arith.constant 0 : i32
    %c0_i32_0 = arith.constant 0 : i32
    return %arg0, %c0_i32 : i32, i32
  }
}

</mosaic_0001>

<bundles_post_ra>
// kernel: tile.8
= control target key start
LH: loop header
LB: loop body
LE: loop exit
PB: predicated region body
PF: predicated region fallthrough
CT: control target
= control target key end

     0   :  { %s28_s0 = inlined_call_operand.vmem [shape: f32[8], index: 0, kind: input, shape index: {}]   ;;  %s29_s1 = inlined_call_operand.vmem [shape: f32[16,8], index: 1, kind: output, shape index: {}]  }
   0x1   :  { %v4_v0 = vld [vmem:[%s28_s0] ss:$0 sm:$0xff] }
   0x2   :  { %5 = vst [vmem:[%s29_s1] sm:$0xff] %v4_v0  ;;  %8 = vst [vmem:[%s29_s1 + $0x8] sm:$0xff] %v4_v0 }

// kernel: tile.9
= control target key start
LH: loop header
LB: loop body
LE: loop exit
PB: predicated region body
PF: predicated region fallthrough
CT: control target
= control target key end

     0   :  { %s133_s10 = smov 120   ;;  %s134_s11 = smov 104   ;;  %vm3_vm0 = vcmask 64512   ;;  %vm9_vm1 = vcmask 1048512   ;;  %vm15_vm2 = vcmask 982912   ;;  %vm21_vm3 = vcmask 917312   ;;  %s209_s0 = inlined_call_operand.vmem [shape: f32[16,8], index: 0, kind: input, shape index: {}]   ;;  %s210_s1 = inlined_call_operand.vmem [shape: f32[1,128], index: 1, kind: output, shape index: {}]  }
   0x1   :  { %v103_v0 = vld [vmem:[%s209_s0 + $0xf] sm:$0x1]   ;;  %v105_v1 = vld [vmem:[%s209_s0 + $0xd] sm:$0x1]   ;;  %v104_v2 = vld [vmem:[%s209_s0 + $0xe] sm:$0x1]  }
   0x2   :  { %7 = vrot.lane.b32.xlu0 %v103_v0, %s133_s10  ;;  %19 = vrot.lane.b32.xlu1 %v105_v1, %s134_s11  ;;  %v106_v3 = vld [vmem:[%s209_s0 + $0xc] sm:$0x1]   ;;  %s135_s16 = smov 112   ;;  %s136_s17 = smov 96   ;;  %v107_v4 = vld [vmem:[%s209_s0 + $0xb] sm:$0x1]  }
   0x3   :  { %v108_v5 = vld [vmem:[%s209_s0 + $0xa] sm:$0x1]   ;;  %v2_v6 = vld [vmem:[%s209_s0] sm:$0x1]   ;;  %s137_s24 = smov 88   ;;  %s138_s25 = smov 80  }
   0x4   :  { %4 = vst.msk [vmem:[#allocation0] sm:$0x1] %vm3_vm0, %v2_v6   ;;  %v109_v7 = vld [vmem:[%s209_s0 + $0x9] sm:$0x1]   ;;  %v110_v8 = vld [vmem:[%s209_s0 + $0x8] sm:$0x1]  }
   0x5   :  { %s139_s30 = smov 72   ;;  %s140_s2 = smov 64   ;;  %v111_v9 = vld [vmem:[%s209_s0 + $0x7] sm:$0x1]   ;;  %v112_v10 = vld [vmem:[%s209_s0 + $0x6] sm:$0x1]  }
   0x6   :  { %13 = vrot.lane.b32.xlu0 %v104_v2, %s135_s16  ;;  %25 = vrot.lane.b32.xlu1 %v106_v3, %s136_s17  ;;  %s141_s7 = smov 56   ;;  %s142_s8 = smov 48   ;;  %v113_v11 = vld [vmem:[%s209_s0 + $0x5] sm:$0x1]   ;;  %v114_v12 = vld [vmem:[%s209_s0 + $0x4] sm:$0x1]  }
   0x7   :  { %s143_s13 = smov 40   ;;  %s144_s14 = smov 32   ;;  %v115_v13 = vld [vmem:[%s209_s0 + $0x3] sm:$0x1]   ;;  %v116_v14 = vld [vmem:[%s209_s0 + $0x2] sm:$0x1]  }
   0x8   :  { %s145_s19 = smov 24   ;;  %s146_s20 = smov 16   ;;  %v117_v15 = vld [vmem:[%s209_s0 + $0x1] sm:$0x1]   ;;  %vm27_vm4 = vcmask 851712   ;;  %vm33_vm5 = vcmask 786112  }
   0x9   :  { %s147_s0 = smov 8   ;;  %vm39_vm6 = vcmask 720512   ;;  %vm45_vm7 = vcmask 654912   ;;  %vm51_vm8 = vcmask 589312   ;;  %vm57_vm9 = vcmask 523712  }
   0xa   :  { %31 = vrot.lane.b32.xlu0 %v107_v4, %s137_s24  ;;  %37 = vrot.lane.b32.xlu1 %v108_v5, %s138_s25  ;;  %vm63_vm10 = vcmask 458112   ;;  %vm69_vm11 = vcmask 392512   ;;  %vm75_vm12 = vcmask 326912   ;;  %vm81_vm13 = vcmask 261312  }
   0xb   :  { %vm87_vm14 = vcmask 195712   ;;  %vm93_vm15 = vcmask 130112  }
   0xe   :  { %43 = vrot.lane.b32.xlu0 %v109_v7, %s139_s30  ;;  %49 = vrot.lane.b32.xlu1 %v110_v8, %s140_s2 }
  0x12   :  { %55 = vrot.lane.b32.xlu0 %v111_v9, %s141_s7  ;;  %61 = vrot.lane.b32.xlu1 %v112_v10, %s142_s8 }
  0x16   :  { %67 = vrot.lane.b32.xlu0 %v113_v11, %s143_s13  ;;  %73 = vrot.lane.b32.xlu1 %v114_v12, %s144_s14 }
  0x1a   :  { %79 = vrot.lane.b32.xlu0 %v115_v13, %s145_s19  ;;  %85 = vrot.lane.b32.xlu1 %v116_v14, %s146_s20 }
  0x1e   :  { %91 = vrot.lane.b32.xlu0 %v117_v15, %s147_s0 }
  0x74   :  { %v8_v16 = vpop.permute.xlu0 %7   ;;  %v20_v17 = vpop.permute.xlu1 %19  }
  0x75   :  { %10 = vst.msk [vmem:[#allocation0] sm:$0x1] %vm9_vm1, %v8_v16  }
  0x78   :  { %v14_v18 = vpop.permute.xlu0 %13   ;;  %v26_v19 = vpop.permute.xlu1 %25  }
  0x79   :  { %16 = vst.msk [vmem:[#allocation0] sm:$0x1] %vm15_vm2, %v14_v18  }
  0x7a   :  { %22 = vst.msk [vmem:[#allocation0] sm:$0x1] %vm21_vm3, %v20_v17  }
  0x7b   :  { %28 = vst.msk [vmem:[#allocation0] sm:$0x1] %vm27_vm4, %v26_v19  }
  0x7c   :  { %v32_v20 = vpop.permute.xlu0 %31   ;;  %v38_v21 = vpop.permute.xlu1 %37  }
  0x7d   :  { %34 = vst.msk [vmem:[#allocation0] sm:$0x1] %vm33_vm5, %v32_v20  }
  0x7e   :  { %40 = vst.msk [vmem:[#allocation0] sm:$0x1] %vm39_vm6, %v38_v21  }
  0x80   :  { %v44_v22 = vpop.permute.xlu0 %43   ;;  %v50_v23 = vpop.permute.xlu1 %49  }
  0x81   :  { %46 = vst.msk [vmem:[#allocation0] sm:$0x1] %vm45_vm7, %v44_v22  }
  0x82   :  { %52 = vst.msk [vmem:[#allocation0] sm:$0x1] %vm51_vm8, %v50_v23  }
  0x84   :  { %v56_v24 = vpop.permute.xlu0 %55   ;;  %v62_v25 = vpop.permute.xlu1 %61  }
  0x85   :  { %58 = vst.msk [vmem:[#allocation0] sm:$0x1] %vm57_vm9, %v56_v24  }
  0x86   :  { %64 = vst.msk [vmem:[#allocation0] sm:$0x1] %vm63_vm10, %v62_v25  }
  0x88   :  { %v68_v26 = vpop.permute.xlu0 %67   ;;  %v74_v27 = vpop.permute.xlu1 %73  }
  0x89   :  { %70 = vst.msk [vmem:[#allocation0] sm:$0x1] %vm69_vm11, %v68_v26  }
  0x8a   :  { %76 = vst.msk [vmem:[#allocation0] sm:$0x1] %vm75_vm12, %v74_v27  }
  0x8c   :  { %v80_v28 = vpop.permute.xlu0 %79   ;;  %v86_v29 = vpop.permute.xlu1 %85  }
  0x8d   :  { %82 = vst.msk [vmem:[#allocation0] sm:$0x1] %vm81_vm13, %v80_v28  }
  0x8e   :  { %88 = vst.msk [vmem:[#allocation0] sm:$0x1] %vm87_vm14, %v86_v29  }
  0x90   :  { %v92_v30 = vpop.permute.xlu0 %91  }
  0x91   :  { %94 = vst.msk [vmem:[#allocation0] sm:$0x1] %vm93_vm15, %v92_v30  }
  0x98   :  { %v99_v31 = vld [vmem:[#allocation0] sm:$0x1] }
  0x99   :  { %102 = vst [vmem:[%s210_s1] sm:$0x1] %v99_v31 }

// kernel: simplified_positional_encoding.1
= control target key start
LH: loop header
LB: loop body
LE: loop exit
PB: predicated region body
PF: predicated region fallthrough
CT: control target
= control target key end

     0   :  { %v133_v0 = vmov 0.0   ;;  %vm134_vm0 = vmmov 0   ;;  %vm28_vm1 = vcmask 392192   ;;  %s182_s1 = inlined_call_operand.vmem [shape: f32[48,128], index: 1, kind: input, shape index: {}]   ;;  %s183_s0 = inlined_call_operand.vmem [shape: f32[8,48], index: 0, kind: input, shape index: {}]   ;;  %s184_s2 = inlined_call_operand.vmem [shape: f32[1,128], index: 2, kind: input, shape index: {}]   ;;  %s185_s3 = inlined_call_operand.vmem [shape: f32[8,128], index: 3, kind: output, shape index: {}]  }
   0x1   :  { %116 = vmatprep.subr.mxu0 %v133_v0  ;;  %v20_v1 = vld [vmem:[%s182_s1 + $0x28] sm:$0xff]  ;;  %v19_v2 = vld [vmem:[%s182_s1 + $0x20] sm:$0xff]  ;;  %128 = vmatprep.mubr.msk.f32.mxu0 %vm134_vm0, %v133_v0  ;;  %v18_v3 = vld [vmem:[%s182_s1 + $0x18] sm:$0xff] }
   0x2   :  { %117 = vmatpush3.msra.mxu0 %v20_v1  ;;  %v17_v4 = vld [vmem:[%s182_s1 + $0x10] sm:$0xff]  ;;  %v16_v5 = vld [vmem:[%s182_s1 + $0x8] sm:$0xff]  ;;  %v15_v6 = vld [vmem:[%s182_s1] sm:$0xff] }
   0x3   :  { %118 = vmatprep.subr.mxu0 %v133_v0  ;;  %v14_v7 = vld [vmem:[%s183_s0] sm:$0xff] }
   0x4   :  { %119 = vmatpush3.msra.mxu0 %v19_v2  ;;  %v107_v8 = vld [vmem:[%s184_s2] ss:$0 sm:$0xff] }
   0x5   :  { %120 = vmatprep.subr.mxu0 %v133_v0 }
   0x6   :  { %121 = vmatpush3.msra.mxu0 %v18_v3 }
   0x7   :  { %122 = vmatprep.subr.mxu0 %v133_v0 }
   0x8   :  { %123 = vmatpush3.msra.mxu0 %v17_v4 }
   0x9   :  { %124 = vmatprep.subr.mxu0 %v133_v0 }
   0xa   :  { %125 = vmatpush3.msra.mxu0 %v16_v5 }
   0xb   :  { %126 = vmatprep.subr.mxu0 %v133_v0 }
   0xc   :  { %127 = vmatpush3.msra.mxu0 %v15_v6 }
   0xd   :  { %129 = vmatmul.mubr.msk.f32.vlgmr.msra.gmra.mxu0 %vm28_vm1, %v14_v7 }
  0xcd   :  { %v98_v9 = vpop.f32.mrf.mxu0 }
  0xce   :  { %v99_v10 = vadd.f32 %v107_v8, %v98_v9 }
  0xcf   :  { %v130_v11 = vpop.f32.mrf.mxu0 }
  0xd0   :  { %102 = vst [vmem:[%s185_s3] sm:$0xff] %v99_v10 }

</bundles_post_ra>
